<compile_context>
chip_gen: v7x
topology: tpu7x:2x2x1
jax: 0.10.0
libtpu: 0.0.40
codegen_flags: <defaults>
</compile_context>

<pallas_src>
import functools
import math

import jax
import jax.numpy as jnp
from jax import lax
from jax.experimental import pallas as pl
from jax.experimental.pallas import tpu as pltpu


_FUSED_BYTES_LIMIT = 8 * 1024 * 1024   # fuse when x (packed) is at most this big
_VMEM_LIMIT = 48 << 20                  # leaves headroom under v7x's 64 MiB VMEM
_PASS1_BLOCK_BYTES = 8 << 20            # input-only streaming reduce
_PASS2_BLOCK_BYTES = 4 << 20            # x block + out block, double-buffered


# ----------------------------------------------------------------------------
# helpers
# ----------------------------------------------------------------------------
def _lane_pack(n_rows, channels):
    """View (N, C) as (N/pack, lcm(C, 128)) so loads/stores are lane-dense."""
    cp = math.lcm(channels, 128)
    pack = cp // channels
    if pack > 1 and n_rows % pack == 0 and cp <= 2048:
        return pack, cp
    return 1, channels


def _tile_rows(n_rows, row_bytes, *, block_bytes):
    """Largest row tile (multiple of 8) keeping one block under block_bytes."""
    if n_rows <= 8:
        return n_rows
    t = min(n_rows, max(8, block_bytes // max(1, row_bytes)))
    return max(8, (t // 8) * 8)


def _fold_packed(col, channels, pack):
    """(1, pack*C) packed column sum -> (1, C) per-channel sum."""
    acc = col[:, 0:channels]
    for p in range(1, pack):
        acc = acc + col[:, p * channels:(p + 1) * channels]
    return acc


def _excite(mean, w1_ref, b1_ref, w2_ref, b2_ref):
    """fc1 -> ReLU -> fc2 -> sigmoid on a (1, C) f32 mean (no in-kernel .T)."""
    h = lax.dot_general(mean, w1_ref[...].astype(jnp.float32),
                        dimension_numbers=(((1,), (1,)), ((), ())),
                        preferred_element_type=jnp.float32)            # (1, H)
    h = jnp.maximum(h + b1_ref[...].astype(jnp.float32), 0.0)
    s = lax.dot_general(h, w2_ref[...].astype(jnp.float32),
                        dimension_numbers=(((1,), (1,)), ((), ())),
                        preferred_element_type=jnp.float32)            # (1, C)
    return jax.nn.sigmoid(s + b2_ref[...].astype(jnp.float32))


# ----------------------------------------------------------------------------
# Fused single-pass kernel (x resident in VMEM): read x once, write out once.
# ----------------------------------------------------------------------------
def _fused_kernel(x_ref, w1_ref, b1_ref, w2_ref, b2_ref, o_ref, *,
                  n_rows, channels, pack):
    xf = x_ref[...].astype(jnp.float32)                     # (rows, cp)
    col = jnp.sum(xf, axis=0, keepdims=True)                # (1, cp)
    mean = _fold_packed(col, channels, pack) * (1.0 / (n_rows * pack))
    s = _excite(mean, w1_ref, b1_ref, w2_ref, b2_ref)       # (1, C) f32
    if pack > 1:
        s = jnp.concatenate([s] * pack, axis=1)             # (1, cp)
    o_ref[...] = (xf * s).astype(o_ref.dtype)


# ----------------------------------------------------------------------------
# Fallback pass 1: streaming column-sum over axis 0 + excitation MLP -> s (1, C)
# ----------------------------------------------------------------------------
def _reduce_excite_kernel(x_ref, w1_ref, b1_ref, w2_ref, b2_ref, s_ref, acc_ref,
                          *, n_rows, channels, pack):
    pid = pl.program_id(0)
    nprog = pl.num_programs(0)
    tile_n, cp = x_ref.shape

    @pl.when(pid == 0)
    def _():
        acc_ref[...] = jnp.zeros_like(acc_ref)

    def _accumulate(mask_rows):
        x = x_ref[...].astype(jnp.float32)
        if mask_rows:
            row = pid * tile_n + lax.broadcasted_iota(jnp.int32, x.shape, 0)
            x = jnp.where(row < n_rows, x, 0.0)
        if tile_n >= 8 and tile_n % 8 == 0:
            # Sublane-preserving partial sums: pure VALU adds per step; the
            # single 8->1 cross-sublane (XLU) reduce happens in the epilogue.
            acc_ref[...] += x.reshape(tile_n // 8, 8, cp).sum(axis=0)
        else:
            acc_ref[0:1, :] += jnp.sum(x, axis=0, keepdims=True)

    if n_rows % tile_n == 0:
        _accumulate(False)
    else:
        # Ragged-row masking only on the last grid step (hoisted off the hot path).
        @pl.when(pid != nprog - 1)
        def _():
            _accumulate(False)

        @pl.when(pid == nprog - 1)
        def _():
            _accumulate(True)

    @pl.when(pid == nprog - 1)
    def _():
        col = jnp.sum(acc_ref[...], axis=0, keepdims=True)              # (1, cp)
        mean = _fold_packed(col, channels, pack) * (1.0 / (n_rows * pack))
        s_ref[...] = _excite(mean, w1_ref, b1_ref, w2_ref, b2_ref).astype(s_ref.dtype)


# ----------------------------------------------------------------------------
# Fallback pass 2: lane-dense streaming channel rescale   out = x * s
# ----------------------------------------------------------------------------
def _scale_kernel(x_ref, s_ref, o_ref):
    o_ref[...] = (x_ref[...].astype(jnp.float32) * s_ref[...]).astype(o_ref.dtype)


# ----------------------------------------------------------------------------
# Wrapper
# ----------------------------------------------------------------------------
@functools.partial(jax.jit, static_argnames=("donate",))
def squeeze_excitation(x, w1, b1, w2, b2, *, donate=False):
    """x: (N, C).  w1: (H, C), b1: (H,), w2: (C, H), b2: (C,), H = C // reduction."""
    n, c = x.shape
    hdim = w1.shape[0]
    itemsize = jnp.dtype(x.dtype).itemsize
    b1_2d = b1.reshape(1, hdim)
    b2_2d = b2.reshape(1, c)

    pack, cp = _lane_pack(n, c)
    rows = n // pack
    xv = x.reshape(rows, cp)                 # free row-major repack to 128 lanes
    aliases = {0: 0} if donate else {}

    # ---------------- fused single-pass path (x fits in VMEM) ----------------
    if n * c * itemsize <= _FUSED_BYTES_LIMIT:
        out = pl.pallas_call(
            functools.partial(_fused_kernel, n_rows=rows, channels=c, pack=pack),
            out_shape=jax.ShapeDtypeStruct((rows, cp), x.dtype),
            grid_spec=pltpu.PrefetchScalarGridSpec(
                num_scalar_prefetch=0,
                grid=(1,),
                in_specs=[
                    pl.BlockSpec((rows, cp), lambda i: (0, 0)),     # x (whole)
                    pl.BlockSpec((hdim, c), lambda i: (0, 0)),      # w1
                    pl.BlockSpec((1, hdim), lambda i: (0, 0)),      # b1
                    pl.BlockSpec((c, hdim), lambda i: (0, 0)),      # w2
                    pl.BlockSpec((1, c), lambda i: (0, 0)),         # b2
                ],
                out_specs=pl.BlockSpec((rows, cp), lambda i: (0, 0)),
            ),
            input_output_aliases=aliases,
            compiler_params=pltpu.CompilerParams(
                dimension_semantics=("arbitrary",),
                vmem_limit_bytes=_VMEM_LIMIT),
            cost_estimate=pl.CostEstimate(
                flops=2 * n * c + 4 * c * hdim,
                transcendentals=c,
                bytes_accessed=2 * n * c * itemsize + 2 * c * hdim * 4),
        )(xv, w1, b1_2d, w2, b2_2d)
        return out.reshape(n, c)

    # ---------------- two-pass streaming fallback (large x) ------------------
    # Pass 1: column-sum reduce over rows + in-kernel excitation MLP.
    tile1 = _tile_rows(rows, cp * itemsize, block_bytes=_PASS1_BLOCK_BYTES)
    grid1 = (pl.cdiv(rows, tile1),)
    s = pl.pallas_call(
        functools.partial(_reduce_excite_kernel, n_rows=rows, channels=c, pack=pack),
        out_shape=jax.ShapeDtypeStruct((1, c), jnp.float32),
        grid_spec=pltpu.PrefetchScalarGridSpec(
            num_scalar_prefetch=0,
            grid=grid1,
            in_specs=[
                pl.BlockSpec((tile1, cp), lambda i: (i, 0)),        # x row tile
                pl.BlockSpec((hdim, c), lambda i: (0, 0)),          # w1 (resident)
                pl.BlockSpec((1, hdim), lambda i: (0, 0)),          # b1
                pl.BlockSpec((c, hdim), lambda i: (0, 0)),          # w2 (resident)
                pl.BlockSpec((1, c), lambda i: (0, 0)),             # b2
            ],
            out_specs=pl.BlockSpec((1, c), lambda i: (0, 0)),       # s (resident)
            scratch_shapes=[pltpu.VMEM((8, cp), jnp.float32)],      # sublane acc
        ),
        compiler_params=pltpu.CompilerParams(
            dimension_semantics=("arbitrary",),                     # reduction axis
            vmem_limit_bytes=_VMEM_LIMIT),
        cost_estimate=pl.CostEstimate(
            flops=n * c + 4 * c * hdim,
            transcendentals=c,
            bytes_accessed=n * c * itemsize + 2 * c * hdim * 4 + c * 4),
    )(xv, w1, b1_2d, w2, b2_2d)

    # Pass 2: lane-dense streaming scale.
    sv = jnp.tile(s, (1, pack)) if pack > 1 else s                  # (1, cp) f32
    tile2 = _tile_rows(rows, cp * itemsize, block_bytes=_PASS2_BLOCK_BYTES)
    grid2 = (pl.cdiv(rows, tile2),)
    out = pl.pallas_call(
        _scale_kernel,
        out_shape=jax.ShapeDtypeStruct((rows, cp), x.dtype),
        grid_spec=pltpu.PrefetchScalarGridSpec(
            num_scalar_prefetch=0,
            grid=grid2,
            in_specs=[
                pl.BlockSpec((tile2, cp), lambda i: (i, 0)),        # x row tile
                pl.BlockSpec((1, cp), lambda i: (0, 0)),            # s (resident)
            ],
            out_specs=pl.BlockSpec((tile2, cp), lambda i: (i, 0)),
        ),
        input_output_aliases=aliases,
        compiler_params=pltpu.CompilerParams(
            dimension_semantics=("parallel",),
            vmem_limit_bytes=_VMEM_LIMIT),
        cost_estimate=pl.CostEstimate(
            flops=n * c,
            transcendentals=0,
            bytes_accessed=2 * n * c * itemsize + cp * 4),
    )(xv, sv)
    return out.reshape(n, c)


def _reference(x, w1, b1, w2, b2):
    se = jnp.mean(x, axis=0, keepdims=True)
    se = jnp.maximum(se @ w1.T + b1, 0.0)
    se = jax.nn.sigmoid(se @ w2.T + b2)
    return x * se


if __name__ == "__main__":
    # SqueezeExcitation(channel=64, reduction=16) -> hidden = 4
    N, C, R = 8, 64, 16
    H = C // R

    key = jax.random.PRNGKey(0)
    kx, k1, k2, k3, k4 = jax.random.split(key, 5)

    x = jax.random.normal(kx, (N, C), dtype=jnp.float32)
    # Deterministic "synthetic checkpoint" init (roughly PyTorch-Linear scaled).
    w1 = jax.random.uniform(k1, (H, C), jnp.float32, -1.0, 1.0) / jnp.sqrt(C)
    b1 = jax.random.uniform(k2, (H,), jnp.float32, -1.0, 1.0) / jnp.sqrt(C)
    w2 = jax.random.uniform(k3, (C, H), jnp.float32, -1.0, 1.0) / jnp.sqrt(H)
    b2 = jax.random.uniform(k4, (C,), jnp.float32, -1.0, 1.0) / jnp.sqrt(H)

    # Small shape -> fused single-pass path.
    out = squeeze_excitation(x, w1, b1, w2, b2)
    jax.block_until_ready(out)
    ref = _reference(x, w1, b1, w2, b2)
    assert out.shape == (N, C)
    assert jnp.allclose(out, ref, atol=1e-5, rtol=1e-5), "fused path mismatch"

    # Larger shape (>8 MiB) -> two-pass streaming path (ragged last tiles included).
    N_big = 40960
    x_big = jax.random.normal(kx, (N_big, C), dtype=jnp.float32)
    out_big = squeeze_excitation(x_big, w1, b1, w2, b2)
    jax.block_until_ready(out_big)
    ref_big = _reference(x_big, w1, b1, w2, b2)
    assert out_big.shape == (N_big, C)
    assert jnp.allclose(out_big, ref_big, atol=1e-4, rtol=1e-4), "two-pass mismatch"

    print("KERNEL_OK")
</pallas_src>

<mosaic_0001>
module attributes {stable_mosaic.version = 11 : i64} {
  func.func @_fused_kernel(%arg0: i32, %arg1: memref<4x128xf32, #tpu.memory_space<vmem>>, %arg2: memref<4x64xf32, #tpu.memory_space<vmem>>, %arg3: memref<1x4xf32, #tpu.memory_space<vmem>>, %arg4: memref<64x4xf32, #tpu.memory_space<vmem>>, %arg5: memref<1x64xf32, #tpu.memory_space<vmem>>, %arg6: memref<4x128xf32, #tpu.memory_space<vmem>>) attributes {dimension_semantics = [#tpu.dimension_semantics<arbitrary>], iteration_bounds = array<i64: 1>, scalar_prefetch = 0 : i64, scratch_operands = 0 : i64, tpu.core_type = #tpu.core_type<tc>, window_params = [{pipeline_mode = #tpu.pipeline_mode<synchronous>, transform_indices = @transform_0, window_bounds = array<i64: 4, 128>}, {pipeline_mode = #tpu.pipeline_mode<synchronous>, transform_indices = @transform_1, window_bounds = array<i64: 4, 64>}, {pipeline_mode = #tpu.pipeline_mode<synchronous>, transform_indices = @transform_2, window_bounds = array<i64: 1, 4>}, {pipeline_mode = #tpu.pipeline_mode<synchronous>, transform_indices = @transform_3, window_bounds = array<i64: 64, 4>}, {pipeline_mode = #tpu.pipeline_mode<synchronous>, transform_indices = @transform_4, window_bounds = array<i64: 1, 64>}, {pipeline_mode = #tpu.pipeline_mode<synchronous>, transform_indices = @transform_5, window_bounds = array<i64: 4, 128>}]} {
    %c0 = arith.constant 0 : index
    %c0_0 = arith.constant 0 : index
    %0 = vector.load %arg1[%c0, %c0_0] : memref<4x128xf32, #tpu.memory_space<vmem>>, vector<4x128xf32>
    %cst = arith.constant dense<0.000000e+00> : vector<128xf32>
    %1 = vector.multi_reduction <add>, %0, %cst [0] : vector<4x128xf32> to vector<128xf32>
    %2 = vector.shape_cast %1 : vector<128xf32> to vector<1x128xf32>
    %3 = vector.extract_strided_slice %2 {offsets = [0, 0], sizes = [1, 64], strides = [1, 1]} : vector<1x128xf32> to vector<1x64xf32>
    %4 = vector.extract_strided_slice %2 {offsets = [0, 64], sizes = [1, 64], strides = [1, 1]} : vector<1x128xf32> to vector<1x64xf32>
    %5 = arith.addf %3, %4 : vector<1x64xf32>
    %cst_1 = arith.constant 1.250000e-01 : f32
    %6 = vector.broadcast %cst_1 : f32 to vector<1x64xf32>
    %7 = arith.mulf %5, %6 : vector<1x64xf32>
    %c0_2 = arith.constant 0 : index
    %c0_3 = arith.constant 0 : index
    %8 = vector.load %arg2[%c0_2, %c0_3] : memref<4x64xf32, #tpu.memory_space<vmem>>, vector<4x64xf32>
    %cst_4 = arith.constant dense<0.000000e+00> : vector<1x4xf32>
    %9 = tpu.matmul %7, %8, %cst_4 {dimension_numbers = #tpu.dot_dimension_numbers<[1], [1], [0], [0], [0, 0, 1, 0], [], []>} : vector<1x64xf32>, vector<4x64xf32>, vector<1x4xf32> -> vector<1x4xf32>
    %c0_5 = arith.constant 0 : index
    %c0_6 = arith.constant 0 : index
    %10 = vector.load %arg3[%c0_5, %c0_6] : memref<1x4xf32, #tpu.memory_space<vmem>>, vector<1x4xf32>
    %11 = arith.addf %9, %10 : vector<1x4xf32>
    %cst_7 = arith.constant 0.000000e+00 : f32
    %12 = vector.broadcast %cst_7 : f32 to vector<1x4xf32>
    %13 = arith.maximumf %11, %12 : vector<1x4xf32>
    %c0_8 = arith.constant 0 : index
    %c0_9 = arith.constant 0 : index
    %14 = vector.load %arg4[%c0_8, %c0_9] : memref<64x4xf32, #tpu.memory_space<vmem>>, vector<64x4xf32>
    %cst_10 = arith.constant dense<0.000000e+00> : vector<1x64xf32>
    %15 = tpu.matmul %13, %14, %cst_10 {dimension_numbers = #tpu.dot_dimension_numbers<[1], [1], [0], [0], [0, 0, 1, 0], [], []>} : vector<1x4xf32>, vector<64x4xf32>, vector<1x64xf32> -> vector<1x64xf32>
    %c0_11 = arith.constant 0 : index
    %c0_12 = arith.constant 0 : index
    %16 = vector.load %arg5[%c0_11, %c0_12] : memref<1x64xf32, #tpu.memory_space<vmem>>, vector<1x64xf32>
    %17 = arith.addf %15, %16 : vector<1x64xf32>
    %18 = arith.negf %17 : vector<1x64xf32>
    %19 = math.exp %18 : vector<1x64xf32>
    %cst_13 = arith.constant 1.000000e+00 : f32
    %20 = vector.broadcast %cst_13 : f32 to vector<1x64xf32>
    %21 = arith.addf %20, %19 : vector<1x64xf32>
    %22 = arith.divf %20, %21 : vector<1x64xf32>
    %23 = tpu.concatenate %22, %22 in 1 : vector<1x64xf32>, vector<1x64xf32> -> vector<1x128xf32>
    %24 = vector.broadcast %23 : vector<1x128xf32> to vector<4x128xf32>
    %25 = arith.mulf %0, %24 : vector<4x128xf32>
    %c0_14 = arith.constant 0 : index
    %c0_15 = arith.constant 0 : index
    %26 = vector.load %arg6[%c0_14, %c0_15] : memref<4x128xf32, #tpu.memory_space<vmem>>, vector<4x128xf32>
    tpu.vector_store %arg6[%c0_14, %c0_15], %25 {strides = array<i32>} : memref<4x128xf32, #tpu.memory_space<vmem>>, vector<4x128xf32>,
    return
  }
  func.func @transform_0(%arg0: i32) -> (i32, i32) {
    %c0_i32 = arith.constant 0 : i32
    %c0_i32_0 = arith.constant 0 : i32
    %c0_i32_1 = arith.constant 0 : i32
    return %c0_i32, %c0_i32_0 : i32, i32
  }
  func.func @transform_1(%arg0: i32) -> (i32, i32) {
    %c0_i32 = arith.constant 0 : i32
    %c0_i32_0 = arith.constant 0 : i32
    %c0_i32_1 = arith.constant 0 : i32
    return %c0_i32, %c0_i32_0 : i32, i32
  }
  func.func @transform_2(%arg0: i32) -> (i32, i32) {
    %c0_i32 = arith.constant 0 : i32
    %c0_i32_0 = arith.constant 0 : i32
    %c0_i32_1 = arith.constant 0 : i32
    return %c0_i32, %c0_i32_0 : i32, i32
  }
  func.func @transform_3(%arg0: i32) -> (i32, i32) {
    %c0_i32 = arith.constant 0 : i32
    %c0_i32_0 = arith.constant 0 : i32
    %c0_i32_1 = arith.constant 0 : i32
    return %c0_i32, %c0_i32_0 : i32, i32
  }
  func.func @transform_4(%arg0: i32) -> (i32, i32) {
    %c0_i32 = arith.constant 0 : i32
    %c0_i32_0 = arith.constant 0 : i32
    %c0_i32_1 = arith.constant 0 : i32
    return %c0_i32, %c0_i32_0 : i32, i32
  }
  func.func @transform_5(%arg0: i32) -> (i32, i32) {
    %c0_i32 = arith.constant 0 : i32
    %c0_i32_0 = arith.constant 0 : i32
    %c0_i32_1 = arith.constant 0 : i32
    return %c0_i32, %c0_i32_0 : i32, i32
  }
}

</mosaic_0001>

<bundles_post_ra>
// kernel: squeeze_excitation.1
= control target key start
LH: loop header
LB: loop body
LE: loop exit
PB: predicated region body
PF: predicated region fallthrough
CT: control target
= control target key end

     0   :  { %vm21_vm0 = vcmask 1043456   ;;  %v314_v2 = vmov 0.0   ;;  %vm37_vm1 = vcmask 523264   ;;  %vm315_vm2 = vmmov 0   ;;  %s317_s28 = smov 64   ;;  %s411_s0 = inlined_call_operand.vmem [shape: f32[4,128], index: 0, kind: input, shape index: {}]   ;;  %s412_s1 = inlined_call_operand.vmem [shape: f32[4,64], index: 1, kind: input, shape index: {}]   ;;  %s413_s3 = inlined_call_operand.vmem [shape: f32[64,4], index: 3, kind: input, shape index: {}]   ;;  %s414_s2 = inlined_call_operand.vmem [shape: f32[1,4], index: 2, kind: input, shape index: {}]   ;;  %s415_s4 = inlined_call_operand.vmem [shape: f32[1,64], index: 4, kind: input, shape index: {}]   ;;  %s416_s5 = inlined_call_operand.vmem [shape: f32[4,128], index: 5, kind: output, shape index: {}]  }
   0x1   :  { %v351_v0 = vld [vmem:[%s411_s0] sm:$0xf]  ;;  %266 = vmatprep.subr.mxu0 %v314_v2  ;;  %268 = vmatprep.mubr.msk.f32.mxu0 %vm315_vm2, %v314_v2  ;;  %vm124_vm3 = vcmask 31744   ;;  %v316_v7 = vmov 0.0|0.0   ;;  %v116_v9 = vld [vmem:[%s413_s3 + $0x8] sm:$0xff]  ;;  %v117_v14 = vld [vmem:[%s413_s3 + $0x10] sm:$0xff]  ;;  %v233_v40 = vlaneseq }
   0x2   :  { %v22_v1 = vsel %vm21_vm0, %v351_v0, 0.0  ;;  %v35_v3 = vld [vmem:[%s412_s1] sm:$0xf]  ;;  %287 = vmatprep.mubr.msk.f32.mxu1 %vm315_vm2, %v314_v2  ;;  %290 = vmatprep.subr.bf16.mxu1 %v316_v7  ;;  %vm366_vm4 = vmpackc.low %vm124_vm3, %vm124_vm3  ;;  %v118_v15 = vld [vmem:[%s413_s3 + $0x18] sm:$0xff] }
   0x3   :  { %v23_v4 = vrot.slane %v22_v1, 4  ;;  %267 = vmatpush3.xpose.msk.msra.mxu0 %vm37_vm1, %v35_v3  ;;  %v115_v8 = vld [vmem:[%s413_s3] sm:$0xff]  ;;  %v295_v17 = vpack.c.bf16 %v118_v15, %v117_v14  ;;  %v120_v19 = vld [vmem:[%s413_s3 + $0x28] sm:$0xff]  ;;  %v121_v21 = vld [vmem:[%s413_s3 + $0x30] sm:$0xff]  ;;  %v234_v41 = vshrl.u32 %v233_v40, 7 }
   0x4   :  { %v291_v11 = vpack.c.bf16 %v116_v9, %v115_v8  ;;  %v119_v18 = vld [vmem:[%s413_s3 + $0x20] sm:$0xff]  ;;  %v122_v22 = vld [vmem:[%s413_s3 + $0x38] sm:$0xff] }
   0x5   :  { %v24_v5 = vadd.f32 %v23_v4, %v22_v1  ;;  %v299_v20 = vpack.c.bf16 %v120_v19, %v119_v18  ;;  %v303_v23 = vpack.c.bf16 %v122_v22, %v121_v21  ;;  %v36_v27 = vld [vmem:[%s414_s2] sm:$0x1]  ;;  %v235_v42 = vsub.s32 0, %v234_v41 }
   0x6   :  { %293 = vmatpush3.bf16.xpose.msk.msra.mxu1 %vm366_vm4, %v291_v11  ;;  %v123_v32 = vld [vmem:[%s415_s4] sm:$0x1] }
   0x7   :  { %v25_v6 = vrot.slane %v24_v5, 2  ;;  %294 = vmatprep.subr.bf16.mxu1 %v316_v7 }
   0x9   :  { %v26_v12 = vadd.f32 %v25_v6, %v24_v5 }
   0xb   :  { %v27_v13 = vrot.slane %v26_v12, 1 }
   0xd   :  { %v28_v16 = vadd.f32 %v27_v13, %v26_v12 }
   0xe   :  { %297 = vmatpush3.bf16.xpose.msk.msra.mxu1 %vm366_vm4, %v295_v17 }
   0xf   :  { %30 = vrot.lane.b32.xlu0 %v28_v16, %s317_s28  ;;  %298 = vmatprep.subr.bf16.mxu1 %v316_v7 }
  0x16   :  { %301 = vmatpush3.bf16.xpose.msk.msra.mxu1 %vm366_vm4, %v299_v20 }
  0x17   :  { %302 = vmatprep.subr.bf16.mxu1 %v316_v7 }
  0x1e   :  { %305 = vmatpush3.bf16.xpose.msk.msra.mxu1 %vm366_vm4, %v303_v23 }
  0x81   :  { %v31_v24 = vpop.permute.xlu0 %30 }
  0x82   :  { %v33_v25 = vadd.f32 %v31_v24, %v28_v16 }
  0x84   :  { %v34_v26 = vmul.f32 0.125, %v33_v25 }
  0x86   :  { %269 = vmatmul.mubr.msk.f32.vlgmr.msra.gmra.mrb[0].mxu0 %vm37_vm1, %v34_v26 }
 0x159   :  { %v110_v28 = vpop.f32.mrb[0].mxu0 }
 0x15a   :  { %v111_v29 = vadd.f32 %v110_v28, %v36_v27  ;;  %v270_v30 = vpop.f32.mrb[1].mxu0 }
 0x15c   :  { %v114_v31 = vmax.f32 %v111_v29, 0.0 }
 0x15e   :  { %288 = vmatmul.mubr.msk.f32.vlgmr.msra.gmra.mrb[0].mxu1 %vm124_vm3, %v114_v31 }
 0x231   :  { %v218_v33 = vpop.f32.mrb[0].mxu1 }
 0x232   :  { %v219_v34 = vadd.f32 %v218_v33, %v123_v32  ;;  %v289_v35 = vpop.f32.mrb[1].mxu1 }
 0x234   :  { %v254_v36 = vmul.f32 -1.442695, %v219_v34 }
 0x236   :  { %310 = vpow2.f32 %v254_v36 }
 0x240   :  { %v311_v37 = vpop.eup %310 }
 0x241   :  { %v225_v38 = vadd.f32 1.0, %v311_v37 }
 0x243   :  { %312 = vrcp.f32 %v225_v38 }
 0x24d   :  { %v313_v39 = vpop.eup %312 }
 0x24e   :  { %229 = vrot.lane.b32.xlu0 %v313_v39, %s317_s28 }
 0x2c0   :  { %v230_v43 = vpop.permute.xlu0 %229 }
 0x2c1   :  { %v232_v44 = vsel %vm37_vm1, %v313_v39, %v230_v43 }
 0x2c2   :  { %v236_v45 = vrot.slane %v232_v44, %v235_v42 }
 0x2c4   :  { %v237_v46 = vmul.f32 %v236_v45, %v351_v0 }
 0x2c6   :  { %238 = vst [vmem:[%s416_s5] sm:$0xf] %v237_v46 }

</bundles_post_ra>
